<compile_context>
chip_gen: v7x
topology: tpu7x:2x2x1
jax: 0.10.0
libtpu: 0.0.40
codegen_flags: <defaults>
</compile_context>

<pallas_src>
import jax
import jax.numpy as jnp
from jax import lax
from jax.experimental import pallas as pl
from jax.experimental.pallas import tpu as pltpu

_IOU_EPS = 1e-6     # bbox_overlaps eps
_GT_EPS = 1e-9      # select_candidates_in_gts / iou_calculator eps
_LANE = 128
_STEP_BUDGET = 12 * 1024 * 1024          # per-step VMEM budget (v7x headroom)
_VMEM_LIMIT = 56 * 1024 * 1024           # raised scoped-VMEM limit (< 64 MiB)


def _round_up(x, m):
    return ((x + m - 1) // m) * m


def _pick_tile(n_anchors, bytes_per_col, max_cols=None):
    """Largest lane-dense anchor tile keeping the per-step footprint bounded.

    Balances tile sizes so the padded tail is minimal (waste < one tile)."""
    full = _round_up(n_anchors, _LANE)
    cap = (_STEP_BUDGET // max(bytes_per_col, 1)) // _LANE * _LANE
    if max_cols is not None:
        cap = min(cap, max_cols)
    cap = max(cap, _LANE)
    n_tiles = -(-full // cap)
    return _round_up(-(-full // n_tiles), _LANE)


def _compiler_params():
    return pltpu.CompilerParams(
        dimension_semantics=("parallel", "parallel"),
        vmem_limit_bytes=_VMEM_LIMIT)


# --------------------------------------------------------------------------- #
# Wrapper-side constant packing
# --------------------------------------------------------------------------- #
def _anchor_slab(anc_f, level_id, apad):
    """(8, Apad) slab: x1, y1, x2, y2, cx, cy, area, level_id (pad level=-1)."""
    n = anc_f.shape[0]
    a = jnp.pad(anc_f, ((0, apad - n), (0, 0))).T                  # (4, Apad)
    cx = (a[0] + a[2]) * 0.5
    cy = (a[1] + a[3]) * 0.5
    area = (a[2] - a[0]) * (a[3] - a[1])
    lvl = jnp.pad(level_id, (0, apad - n), constant_values=-1.0)
    return jnp.stack([a[0], a[1], a[2], a[3], cx, cy, area, lvl], axis=0)


def _gt_slab(gt_f, thr):
    """(bs, M, 8) slab: x1, y1, x2, y2, cx, cy, area, iou_threshold."""
    cx = (gt_f[..., 0:1] + gt_f[..., 2:3]) * 0.5
    cy = (gt_f[..., 1:2] + gt_f[..., 3:4]) * 0.5
    area = (gt_f[..., 2:3] - gt_f[..., 0:1]) * (gt_f[..., 3:4] - gt_f[..., 1:2])
    return jnp.concatenate([gt_f, cx, cy, area, thr], axis=-1)


# --------------------------------------------------------------------------- #
# Kernel A: negated squared GT-center <-> anchor-center distances
# --------------------------------------------------------------------------- #
def _dist2_kernel(gtc_ref, anc_ref, out_ref):
    gtc = gtc_ref[0]                                   # (M, 2) gt centers
    gcx = gtc[:, 0:1]
    gcy = gtc[:, 1:2]
    anc = anc_ref[...]                                 # (8, TA)
    acx = anc[4:5, :]
    acy = anc[5:6, :]
    dx = gcx - acx
    dy = gcy - acy
    # Negated + sqrt dropped: downstream lax.top_k (largest) on this map
    # selects exactly the smallest distances, no wrapper-side negation pass.
    out_ref[0] = -(dx * dx + dy * dy)


def _pairwise_neg_dist2(gt_centers, anc_slab, ta):
    bs, m, _ = gt_centers.shape
    apad = anc_slab.shape[1]
    n_tiles = apad // ta
    return pl.pallas_call(
        _dist2_kernel,
        out_shape=jax.ShapeDtypeStruct((bs, m, apad), jnp.float32),
        grid=(bs, n_tiles),
        in_specs=[pl.BlockSpec((1, m, 2), lambda b, a: (b, 0, 0)),
                  pl.BlockSpec((8, ta), lambda b, a: (0, a))],
        out_specs=pl.BlockSpec((1, m, ta), lambda b, a: (b, 0, a)),
        compiler_params=_compiler_params(),
    )(gt_centers, anc_slab)


# --------------------------------------------------------------------------- #
# Kernel B: fused pairwise maps + positive mask + highest-overlap resolution
# + masked pd-IoU max.  Only (bs, A)-sized reductions leave the kernel.
# --------------------------------------------------------------------------- #
def _assign_kernel(gt_ref, anc_ref, pd_ref, kth_ref, fg_ref, tgt_ref, iou_ref):
    m = gt_ref.shape[1]
    ta = anc_ref.shape[1]
    n_levels = kth_ref.shape[2]

    gt = gt_ref[0]                                     # (M, 8)
    gx1 = gt[:, 0:1]; gy1 = gt[:, 1:2]
    gx2 = gt[:, 2:3]; gy2 = gt[:, 3:4]
    gcx = gt[:, 4:5]; gcy = gt[:, 5:6]
    area_g = gt[:, 6:7]; thr = gt[:, 7:8]

    anc = anc_ref[...]                                 # (8, TA)
    ax1 = anc[0:1, :]; ay1 = anc[1:2, :]
    ax2 = anc[2:3, :]; ay2 = anc[3:4, :]
    acx = anc[4:5, :]; acy = anc[5:6, :]
    area_a = anc[6:7, :]; lvl = anc[7:8, :]

    # --- bbox_overlaps(mode='iou'): gt rows vs anchor cols (exact divide) ---
    w = jnp.maximum(jnp.minimum(gx2, ax2) - jnp.maximum(gx1, ax1), 0.0)
    h = jnp.maximum(jnp.minimum(gy2, ay2) - jnp.maximum(gy1, ay1), 0.0)
    inter = w * h
    overlaps = inter / jnp.maximum(area_g + area_a - inter, _IOU_EPS)  # (M,TA)

    # --- select_candidates_in_gts: anchor center strictly inside gt box -----
    d_min = jnp.minimum(jnp.minimum(acx - gx1, acy - gy1),
                        jnp.minimum(gx2 - acx, gy2 - acy))
    in_gts = d_min > _GT_EPS                           # (M, TA) bool

    # --- candidate membership via distance threshold -------------------------
    # dist2 recomputed from slab constants; kth holds the k-th smallest dist2
    # per (gt, level) (-1 for invalid gts -> never a candidate; padded anchors
    # carry level_id=-1 -> threshold stays -1 -> never a candidate).
    # TODO(synk): exact ties at the k-th distance admit >k candidates (the
    # PyTorch reference picks exactly k by index order); rare with real data.
    dx = gcx - acx
    dy = gcy - acy
    dist2 = dx * dx + dy * dy
    kth = kth_ref[0]                                   # (M, n_levels)
    kth_sel = jnp.where(lvl == 0.0, kth[:, 0:1], -1.0)
    for l in range(1, n_levels):
        kth_sel = jnp.where(lvl == float(l), kth[:, l:l + 1], kth_sel)
    in_cand = dist2 <= kth_sel                         # (M, TA) bool

    # --- positive mask -------------------------------------------------------
    mask_pos = (in_cand & (overlaps > thr) & in_gts).astype(jnp.float32)

    # --- select_highest_overlaps (per-anchor, branch-free) -------------------
    fg_count = jnp.sum(mask_pos, axis=0, keepdims=True)             # (1, TA)
    multi = fg_count > 1.0
    row = lax.broadcasted_iota(jnp.int32, (m, ta), 0)

    ov_max = jnp.max(overlaps, axis=0, keepdims=True)
    amax_ov = jnp.min(jnp.where(overlaps == ov_max, row, m),
                      axis=0, keepdims=True)                        # (1, TA)
    # argmax(mask_pos) without an extra XLU reduction: its max is fg_count > 0.
    is_mp_max = (mask_pos > 0.5) | (fg_count <= 0.5)
    amax_mp = jnp.min(jnp.where(is_mp_max, row, m),
                      axis=0, keepdims=True)                        # (1, TA)

    tgt = jnp.where(multi, amax_ov, amax_mp)                        # (1, TA)
    fg = jnp.where(multi, 1.0, fg_count)                            # (1, TA)

    # --- iou_calculator(gt, pd) single masked max (score rescale only) -------
    pd = pd_ref[0]                                     # (4, TA)
    px1 = pd[0:1, :]; py1 = pd[1:2, :]
    px2 = pd[2:3, :]; py2 = pd[3:4, :]
    ow = jnp.maximum(jnp.minimum(gx2, px2) - jnp.maximum(gx1, px1), 0.0)
    oh = jnp.maximum(jnp.minimum(gy2, py2) - jnp.maximum(gy1, py1), 0.0)
    ovl = ow * oh
    a1 = jnp.maximum(gx2 - gx1, 0.0) * jnp.maximum(gy2 - gy1, 0.0)
    a2 = jnp.maximum(px2 - px1, 0.0) * jnp.maximum(py2 - py1, 0.0)
    # approx reciprocal (EUP): only scales target_scores, never thresholded.
    pd_iou = ovl * pl.reciprocal(a1 + a2 - ovl + _GT_EPS, approx=True)

    sel = jnp.where(multi, row == amax_ov, mask_pos > 0.5)
    iou_final = jnp.max(jnp.where(sel, pd_iou, 0.0), axis=0, keepdims=True)

    fg_ref[0] = fg
    tgt_ref[0] = tgt
    iou_ref[0] = iou_final


def _fused_assign(gt_slab, anc_slab, pd_t, kth_dist2, ta):
    bs, m, _ = gt_slab.shape
    apad = anc_slab.shape[1]
    n_tiles = apad // ta
    n_levels = kth_dist2.shape[2]
    const_map = lambda b, a: (b, 0, 0)   # constant across A-tiles -> no re-DMA
    tile_map = lambda b, a: (b, 0, a)
    out_sd = lambda dt: jax.ShapeDtypeStruct((bs, 1, apad), dt)
    return pl.pallas_call(
        _assign_kernel,
        out_shape=[out_sd(jnp.float32), out_sd(jnp.int32), out_sd(jnp.float32)],
        grid=(bs, n_tiles),
        in_specs=[
            pl.BlockSpec((1, m, 8), const_map),              # gt slab
            pl.BlockSpec((8, ta), lambda b, a: (0, a)),      # anchor slab
            pl.BlockSpec((1, 4, ta), tile_map),              # pred boxes (T)
            pl.BlockSpec((1, m, n_levels), const_map),       # k-th dist2 / level
        ],
        out_specs=[pl.BlockSpec((1, 1, ta), tile_map)] * 3,
        compiler_params=_compiler_params(),
    )(gt_slab, anc_slab, pd_t, kth_dist2)


# --------------------------------------------------------------------------- #
# Full ATSSAssigner.forward
# --------------------------------------------------------------------------- #
def atss_assign(anc_bboxes, n_level_bboxes, gt_labels, gt_bboxes, mask_gt,
                pd_bboxes, topk=9, num_classes=80):
    """JAX/Pallas port of ATSSAssigner.forward (inference-only, no grad)."""
    bs, n_max_boxes, _ = gt_bboxes.shape
    n_anchors = anc_bboxes.shape[0]
    n_levels = len(n_level_bboxes)
    bg_idx = num_classes

    if n_max_boxes == 0:
        return (jnp.full((bs, n_anchors), bg_idx, jnp.int32),
                jnp.zeros((bs, n_anchors, 4), jnp.float32),
                jnp.zeros((bs, n_anchors, num_classes), jnp.float32),
                jnp.zeros((bs, n_anchors), bool))

    gt_f = gt_bboxes.astype(jnp.float32)
    mask_gt_f = mask_gt.astype(jnp.float32)
    anc_f = anc_bboxes.astype(jnp.float32)

    # ---- tile / padding selection (decoupled per kernel) ---------------------
    m = n_max_boxes
    ta_a = _pick_tile(n_anchors, 8 * m + 64)             # dist map: big tiles
    ta_b = _pick_tile(n_anchors, 64 * m + 64, max_cols=2048)
    apad_a = _round_up(n_anchors, ta_a)
    apad_b = _round_up(n_anchors, ta_b)

    level_id = jnp.concatenate(
        [jnp.full((n,), float(l), jnp.float32)
         for l, n in enumerate(n_level_bboxes)])
    anc_slab_a = _anchor_slab(anc_f, level_id, apad_a)
    anc_slab_b = (anc_slab_a if apad_b == apad_a
                  else _anchor_slab(anc_f, level_id, apad_b))
    pd_t = jnp.transpose(
        jnp.pad(pd_bboxes.astype(jnp.float32),
                ((0, 0), (0, apad_b - n_anchors), (0, 0))),
        (0, 2, 1))                                                  # (bs,4,Apad)
    gt_centers = jnp.concatenate(
        [(gt_f[..., 0:1] + gt_f[..., 2:3]) * 0.5,
         (gt_f[..., 1:2] + gt_f[..., 3:4]) * 0.5], axis=-1)         # (bs, M, 2)

    # ---- kernel A: negated squared center distances (only big HBM map) ------
    neg_dist2 = _pairwise_neg_dist2(gt_centers, anc_slab_a, ta_a)   # (bs,M,ApadA)

    # ---- select_topk_candidates ----------------------------------------------
    # TODO(synk): per-level top-k is a data-dependent sort; stays in plain JAX.
    candidate_idxs = []
    kth_dist2 = []
    start = 0
    for per_level in n_level_bboxes:
        end = start + per_level
        k = min(topk, per_level)
        vals, idxs = lax.top_k(neg_dist2[..., start:end], k)
        candidate_idxs.append(idxs + start)
        kth_dist2.append(-vals[..., k - 1:k])        # k-th smallest dist2
        start = end
    candidate_idxs = jnp.concatenate(candidate_idxs, axis=-1).astype(jnp.int32)
    kth_dist2 = jnp.concatenate(kth_dist2, axis=-1)                 # (bs,M,L)
    # invalid GTs never get candidates (matches reference for topk >= 2).
    kth_dist2 = jnp.where(mask_gt_f > 0, kth_dist2, -1.0)

    # ---- thres_calculator on the small candidate set only --------------------
    # For valid GTs every candidate index has is_in_candidate == 1 (per-level
    # top-k indices are distinct, level ranges disjoint), so the reference's
    # gather of masked overlaps equals the IoU at the candidate anchors;
    # invalid GT rows are zeroed (their threshold never affects outputs).
    cand_anc = jnp.take(anc_f, candidate_idxs, axis=0)              # (bs,M,nc,4)
    gx1 = gt_f[..., 0:1]; gy1 = gt_f[..., 1:2]
    gx2 = gt_f[..., 2:3]; gy2 = gt_f[..., 3:4]
    cx1 = cand_anc[..., 0]; cy1 = cand_anc[..., 1]
    cx2 = cand_anc[..., 2]; cy2 = cand_anc[..., 3]
    iw = jnp.maximum(jnp.minimum(gx2, cx2) - jnp.maximum(gx1, cx1), 0.0)
    ih = jnp.maximum(jnp.minimum(gy2, cy2) - jnp.maximum(gy1, cy1), 0.0)
    inter = iw * ih
    area_g = (gx2 - gx1) * (gy2 - gy1)
    area_c = (cx2 - cx1) * (cy2 - cy1)
    cand_ov = inter / jnp.maximum(area_g + area_c - inter, _IOU_EPS)
    cand_ov = cand_ov * mask_gt_f
    ov_mean = cand_ov.mean(axis=-1, keepdims=True)
    # torch unbiased std; NaN if total candidate count is 1 (same as reference).
    ov_std = jnp.std(cand_ov, axis=-1, ddof=1, keepdims=True)
    thr = ov_mean + ov_std                                          # (bs, M, 1)

    # ---- kernel B: fused mask / highest-overlap / pd-IoU reduction ----------
    gt_slab = _gt_slab(gt_f, thr)                                   # (bs, M, 8)
    fg3, tgt3, iou3 = _fused_assign(gt_slab, anc_slab_b, pd_t, kth_dist2, ta_b)
    fg_mask = fg3[:, 0, :n_anchors]                                 # (bs, A)
    target_gt_idx = tgt3[:, 0, :n_anchors]                          # (bs, A)
    ious = iou3[:, 0, :n_anchors]                                   # (bs, A)

    # ---- get_targets ----------------------------------------------------------
    batch_idx = jnp.arange(bs, dtype=target_gt_idx.dtype)[:, None]
    flat_idx = (target_gt_idx + batch_idx * n_max_boxes).reshape(-1)
    target_labels = gt_labels.reshape(-1)[flat_idx].reshape(bs, n_anchors)
    target_labels = jnp.where(fg_mask > 0, target_labels, bg_idx)
    target_bboxes = gt_f.reshape(-1, 4)[flat_idx].reshape(bs, n_anchors, 4)
    target_scores = jax.nn.one_hot(target_labels, num_classes + 1,
                                   dtype=jnp.float32)[:, :, :num_classes]
    target_scores = target_scores * ious[..., None]

    return (target_labels.astype(jnp.int32), target_bboxes, target_scores,
            fg_mask.astype(bool))


if __name__ == "__main__":
    key = jax.random.PRNGKey(0)
    bs, n_max_boxes = 2, 8
    n_level_bboxes = [80, 32, 16]           # each level >= topk
    n_anchors = sum(n_level_bboxes)         # 128
    topk, num_classes = 9, 16

    k1, k2, k3, k4 = jax.random.split(key, 4)

    def make_boxes(k, lead_shape, max_xy=64.0, max_wh=16.0):
        kc, ks = jax.random.split(k)
        c = jax.random.uniform(kc, lead_shape + (2,), minval=0.0, maxval=max_xy)
        wh = jax.random.uniform(ks, lead_shape + (2,), minval=2.0,
                                maxval=max_wh)
        return jnp.concatenate([c - wh / 2, c + wh / 2], axis=-1)

    anc_bboxes = make_boxes(k1, (n_anchors,), max_wh=12.0)          # (A, 4)
    gt_bboxes = make_boxes(k2, (bs, n_max_boxes), max_wh=28.0)      # (bs, M, 4)
    pd_bboxes = make_boxes(k3, (bs, n_anchors), max_wh=12.0)        # (bs, A, 4)
    gt_labels = jax.random.randint(k4, (bs, n_max_boxes, 1), 0, num_classes)
    n_valid = jnp.array([[5], [7]])
    mask_gt = (jnp.arange(n_max_boxes)[None, :, None]
               < n_valid[:, None, :]).astype(jnp.float32)           # (bs, M, 1)

    target_labels, target_bboxes, target_scores, fg_mask = atss_assign(
        anc_bboxes, n_level_bboxes, gt_labels, gt_bboxes, mask_gt, pd_bboxes,
        topk=topk, num_classes=num_classes)

    jax.block_until_ready((target_labels, target_bboxes, target_scores,
                           fg_mask))
    assert target_labels.shape == (bs, n_anchors)
    assert target_bboxes.shape == (bs, n_anchors, 4)
    assert target_scores.shape == (bs, n_anchors, num_classes)
    assert fg_mask.shape == (bs, n_anchors)
    print("KERNEL_OK")
</pallas_src>

<mosaic_0001>
module attributes {stable_mosaic.version = 11 : i64} {
  func.func @_dist2_kernel(%arg0: i32, %arg1: i32, %arg2: memref<1x8x2xf32, #tpu.memory_space<vmem>>, %arg3: memref<8x128xf32, #tpu.memory_space<vmem>>, %arg4: memref<1x8x128xf32, #tpu.memory_space<vmem>>) attributes {dimension_semantics = [#tpu.dimension_semantics<parallel>, #tpu.dimension_semantics<parallel>], iteration_bounds = array<i64: 2, 1>, scalar_prefetch = 0 : i64, scratch_operands = 0 : i64, tpu.core_type = #tpu.core_type<tc>, window_params = [{transform_indices = @transform_0, window_bounds = array<i64: 1, 8, 2>}, {transform_indices = @transform_1, window_bounds = array<i64: 8, 128>}, {transform_indices = @transform_2, window_bounds = array<i64: 1, 8, 128>}]} {
    %c0 = arith.constant 0 : index
    %c0_0 = arith.constant 0 : index
    %c0_1 = arith.constant 0 : index
    %0 = vector.load %arg2[%c0, %c0_0, %c0_1] : memref<1x8x2xf32, #tpu.memory_space<vmem>>, vector<1x8x2xf32>
    %1 = vector.shape_cast %0 : vector<1x8x2xf32> to vector<8x2xf32>
    %2 = vector.extract_strided_slice %1 {offsets = [0, 0], sizes = [8, 1], strides = [1, 1]} : vector<8x2xf32> to vector<8x1xf32>
    %3 = vector.extract_strided_slice %1 {offsets = [0, 1], sizes = [8, 1], strides = [1, 1]} : vector<8x2xf32> to vector<8x1xf32>
    %c0_2 = arith.constant 0 : index
    %c0_3 = arith.constant 0 : index
    %4 = vector.load %arg3[%c0_2, %c0_3] : memref<8x128xf32, #tpu.memory_space<vmem>>, vector<8x128xf32>
    %5 = vector.extract_strided_slice %4 {offsets = [4, 0], sizes = [1, 128], strides = [1, 1]} : vector<8x128xf32> to vector<1x128xf32>
    %6 = vector.extract_strided_slice %4 {offsets = [5, 0], sizes = [1, 128], strides = [1, 1]} : vector<8x128xf32> to vector<1x128xf32>
    %7 = vector.broadcast %2 : vector<8x1xf32> to vector<8x128xf32>
    %8 = vector.broadcast %5 : vector<1x128xf32> to vector<8x128xf32>
    %9 = arith.subf %7, %8 : vector<8x128xf32>
    %10 = vector.broadcast %3 : vector<8x1xf32> to vector<8x128xf32>
    %11 = vector.broadcast %6 : vector<1x128xf32> to vector<8x128xf32>
    %12 = arith.subf %10, %11 : vector<8x128xf32>
    %13 = arith.mulf %9, %9 : vector<8x128xf32>
    %14 = arith.mulf %12, %12 : vector<8x128xf32>
    %15 = arith.addf %13, %14 : vector<8x128xf32>
    %cst = arith.constant 0.000000e+00 : f32
    %16 = vector.broadcast %cst : f32 to vector<8x128xf32>
    %17 = arith.subf %16, %15 : vector<8x128xf32>
    %c0_4 = arith.constant 0 : index
    %c0_5 = arith.constant 0 : index
    %c0_6 = arith.constant 0 : index
    %18 = vector.load %arg4[%c0_4, %c0_5, %c0_6] : memref<1x8x128xf32, #tpu.memory_space<vmem>>, vector<1x8x128xf32>
    %19 = vector.shape_cast %18 : vector<1x8x128xf32> to vector<8x128xf32>
    %20 = vector.shape_cast %17 : vector<8x128xf32> to vector<1x8x128xf32>
    tpu.vector_store %arg4[%c0_4, %c0_5, %c0_6], %20 {strides = array<i32>} : memref<1x8x128xf32, #tpu.memory_space<vmem>>, vector<1x8x128xf32>,
    return
  }
  func.func @transform_0(%arg0: i32, %arg1: i32) -> (i32, i32, i32) {
    %c0_i32 = arith.constant 0 : i32
    %c0_i32_0 = arith.constant 0 : i32
    %c0_i32_1 = arith.constant 0 : i32
    return %arg0, %c0_i32, %c0_i32_0 : i32, i32, i32
  }
  func.func @transform_1(%arg0: i32, %arg1: i32) -> (i32, i32) {
    %c0_i32 = arith.constant 0 : i32
    %c0_i32_0 = arith.constant 0 : i32
    return %c0_i32, %arg1 : i32, i32
  }
  func.func @transform_2(%arg0: i32, %arg1: i32) -> (i32, i32, i32) {
    %c0_i32 = arith.constant 0 : i32
    %c0_i32_0 = arith.constant 0 : i32
    return %arg0, %c0_i32, %arg1 : i32, i32, i32
  }
}

</mosaic_0001>

<bundles_post_ra>
// kernel: tpu_custom_call.1
= control target key start
LH: loop header
LB: loop body
LE: loop exit
PB: predicated region body
PF: predicated region fallthrough
CT: control target
= control target key end

     0   :  { %7 = vsyncpa [#allocation3], 0  ;;  %s578_s0 = inlined_call_operand.vmem [shape: f32[2,8,2], index: 0, kind: input, shape index: {}]   ;;  %s579_s1 = inlined_call_operand.vmem [shape: f32[8,128], index: 1, kind: input, shape index: {}]   ;;  %s580_s2 = inlined_call_operand.hbm [shape: f32[2,8,128], index: 2, kind: output, shape index: {}]  }
   0x1   :  { %9 = vsyncpa [#allocation3 + $0x1], 0  ;;  %s463_s9 = smov 0   ;;  %s465_s10 = smov 0  }
   0x2   :  { %s467_s11 = smov 0   ;;  %s469_s12 = smov 0  }
   0x3   :  { %s471_s13 = smov 0   ;;  %s473_s14 = smov 0  }
   0x4 LB: > { %s294_s15 = sadd.s32 4294967295, %s443_s14   ;;  %s295_s16 = sadd.s32 4294967294, %s443_s14   ;;  %s443_s14 = sphi %s473_s14, %s15_s14   ;;  %s439_s13 = sphi %s471_s13, %s587_s13   ;;  %s435_s12 = sphi %s469_s12, %s586_s12   ;;  %s431_s11 = sphi %s467_s11, %s585_s11   ;;  %s427_s10 = sphi %s465_s10, %s584_s10   ;;  %s423_s9 = sphi %s463_s9, %s583_s9  }
   0x5   : > { %s27_s17 = sadd.s32 1, %s439_s13  ;;  %s88_s18 = sadd.s32 1, %s431_s11 }
   0x6   : > { %p29_p0 = scmp.ge.s32.totalorder %s27_s17, 2  ;;  %p98_p1 = scmp.ne.s32.totalorder %s431_s11, %s427_s10 }
   0x7   : > { %p99_p2 = scmp.eq.s32.totalorder %s294_s15, 1  ;;  %p104_p3 = scmp.ne.s32.totalorder %s427_s10, %s423_s9 }
   0x8   : > { %s589_s17 = smov (%p29_p0, %s27_s17), 0  ;;  %p105_p5 = scmp.eq.s32.totalorder %s295_s16, 1 }
   0x9   : > { %p503_p4 = por %p99_p2, %p98_p1  ;;  %s83_s20 = ssub.s32 %s439_s13, %s589_s17 }
   0xa   : > { %p299_p6 = scmp.ge.s32.totalorder %s443_s14, 1  ;;  %p86_p7 = scmp.eq.s32.totalorder %s83_s20, 0 }
   0xb   : > { %p510_p8 = por %p105_p5, %p104_p3  ;;  %p137_p9 = scmp.lt.s32.totalorder %s443_s14, 3 }
   0xc   : > { %s516_s22 = scalar_select %p86_p7, %s431_s11, %s88_s18  }
   0xd   : > { %p138_p10 = pnand %p299_p6, %p137_p9 }
   0xe   : > { %p162_p11 = scmp.lt.s32.totalorder (!%p138_p10), %s435_s12, 1  ;;  %v445_v0 = vmov (!%p138_p10), 0   ;;  %v446_v2 = vmov (!%p138_p10), 1   ;;  %v177_v3 = vlaneseq (!%p138_p10)  ;;  %v171_v6 = vld [vmem:[%s579_s1] sm:$0xff] (!%p138_p10)  ;;  %s159_s30 = sand.u32 (!%p138_p10), 1, %s427_s10  }
   0xf   : > { %141 = sbr.rel (%p138_p10) target bundleno = 182 (0xb6), region = 28  ;;  %363 = vset.pattern.permute.xlu0 (!%p138_p10), %v445_v0  ;;  %s300_s3 = sshll.u32 (!%p138_p10), %s159_s30, 3 }
  0x10   : > { %v178_v4 = vshrl.u32 (!%p138_p10), %v177_v3, 7  ;;  %s303_s4 = sshll.u32 (!%p138_p10), %s435_s12, 7  ;;  %s161_s5 = scalar_lea.vmem (!%p138_p10), [#allocation2], %s300_s3 }
  0x11   : > { %s211_s6 = sshll.u32 (!%p138_p10), %s161_s5, 4  ;;  %s531_s15 = scalar_lea.hbm (!%p138_p10), %s580_s2, %s303_s4  ;;  %s533_s6 = int_to_ptr.vmem [resolvable:$true] %s211_s6 }
  0x12   : > { %v179_v5 = vsub.s32 (!%p138_p10), 4, %v178_v4  ;;  %v188_v7 = vsub.s32 (!%p138_p10), 5, %v178_v4  ;;  %s197_s16 = scalar_lea.sflag (!%p138_p10), [#allocation3], %s159_s30  ;;  %s365_s18 = scalar_lea.vmem (!%p138_p10), %s533_s6, 128 }
  0x13   : > { %p366_p12 = scmp.ne.s32.totalorder (!%p138_p10), %s533_s6, %s365_s18 }
  0x14   : > { %v180_v8 = vrot.slane (!%p138_p10), %v171_v6, %v179_v5  ;;  %v189_v10 = vrot.slane (!%p138_p10), %v171_v6, %v188_v7 }
  0x15   : > { %p367_p13 = pnand (!%p138_p10), %p366_p12, %p503_p4 }
  0x16   : > { %s163_s23 = scalar_select %p162_p11, %s435_s12, 1 }
  0x17   : > { %p368_p0 = pneg %p367_p13  ;;  %s447_s12 = smov [#allocation2]  }
  0x18   : > { %s301_s24 = sshll.u32 %s163_s23, 3  ;;  %s369_s20 = sshll.u32 %s447_s12, 4  ;;  %s370_s20 = int_to_ptr.vmem [resolvable:$false] %s369_s20 }
  0x19   : > { %s165_s27 = scalar_lea.vmem %s578_s0, %s301_s24  ;;  %s371_s23 = scalar_lea.vmem %s370_s20, 256 }
  0x1a   : > { %v170_v1 = vld [vmem:[%s165_s27] sm:$0xff]  ;;  %p372_p1 = scmp.lt.s32.totalorder %s533_s6, %s370_s20  ;;  %p373_p2 = scmp.lt.s32.totalorder %s371_s23, %s365_s18 }
  0x1b   : > { %174 = vperm.xlu0 %363, %v170_v1  }
  0x1c   : > { %p374_p3 = por %p373_p2, %p372_p1 }
  0x1e   : > { %p375_p5 = pnand %p374_p3, %p368_p0 }
  0x1f   : > { %364 = vset.pattern.permute.xlu0 %v446_v2 }
  0x20   : > { %183 = vperm.xlu0 %364, %v170_v1  }
  0x9a   : > { %v175_v9 = vpop.permute.xlu0 %174 }
  0x9b   : > { %v181_v11 = vsub.f32 %v175_v9, %v180_v8 }
  0x9d   : > { %v191_v14 = vmul.f32 %v181_v11, %v181_v11 }
  0x9f   : > { %v184_v12 = vpop.permute.xlu0 %183 }
  0xa0   : > { %v190_v13 = vsub.f32 %v184_v12, %v189_v10 }
  0xa2   : > { %v192_v15 = vmul.f32 %v190_v13, %v190_v13 }
  0xa4   : > { %v193_v16 = vadd.f32 %v192_v15, %v191_v14 }
  0xa6   : > { %v194_v17 = vsub.f32 0.0, %v193_v16 }
  0xa8   : > { %195 = vst [vmem:[%s161_s5] sm:$0xff] %v194_v17 }
  0xa9   : > { %378 = shalt.err (!%p375_p5)
}
  0xaa   : > { %s379_s24 = scalar_lea.hbm %s531_s15, 128  ;;  %s383_s27 = scalar_lea.hbm %s580_s2, 256 }
  0xab   : > { %p380_p6 = scmp.ne.s32.totalorder %s531_s15, %s379_s24  ;;  %p384_p10 = scmp.lt.u32.totalorder %s531_s15, %s580_s2 }
  0xac   : > { %p385_p11 = scmp.lt.u32.totalorder %s383_s27, %s379_s24  ;;  %p387_p13 = scmp.lt.u32.totalorder %s379_s24, %s531_s15 }
  0xad   : > { %p381_p7 = pnand %p380_p6, %p503_p4 }
  0xae   : > { %p386_p12 = por %p385_p11, %p384_p10 }
  0xaf   : > { %p382_p9 = pneg %p381_p7 }
  0xb0   : > { %p388_p0 = por %p387_p13, %p386_p12 }
  0xb2   : > { %p389_p1 = pnand %p388_p0, %p382_p9 }
  0xb4   : > { %392 = shalt.err (!%p389_p1)
}
  0xb5   : > { %306 = dma.vmem_to_hbm [thread:$0]  (%p503_p4), %s533_s6, 128, %s531_s15, %s197_s16  }
  0xb6 PF: > { %p312_p2 = scmp.ge.s32.totalorder %s443_s14, 2  ;;  %s223_s30 = sand.u32 1, %s423_s9  }
  0xb7   : > { %s224_s3 = scalar_lea.sflag [#allocation3], %s223_s30 }
  0xb8   : > { %p309_p3 = pnand %p312_p2, %p510_p8 }
  0xba   : > { %418 = dma.done.wait (!%p309_p3), %s224_s3, 128  }
  0xbb   : > { %420 = vsyncadd (!%p309_p3), %s224_s3, 4294967168  ;;  %s15_s14 = sadd.s32 1, %s443_s14   ;;  %s583_s9 = smov %s427_s10 }
  0xbc   : > { %p12_p5 = scmp.ge.s32.totalorder %s15_s14, 4   ;;  %s584_s10 = smov %s431_s11 }
  0xbd   : > { %s585_s11 = smov %s516_s22  ;;  %s586_s12 = smov %s439_s13 }
  0xbe   : > { %s587_s13 = smov %s589_s17  ;;  %14 = sbr.rel (!%p12_p5) target bundleno = 4 (0x4), region = 66 }
  0xc5   :  { %229 = vsyncpa [#allocation3], 1 }
  0xc6   :  { %231 = vsyncpa [#allocation3 + $0x1], 1 }

</bundles_post_ra>
